<compile_context>
chip_gen: v6e
topology: v6e:2x2x1
jax: 0.10.0
libtpu: 0.0.40
codegen_flags: <defaults>
</compile_context>

<pallas_src>
import functools

import jax
import jax.numpy as jnp
from jax.experimental import pallas as pl
from jax.experimental.pallas import tpu as pltpu

BN_EPS = 1e-5
_VMEM_LIMIT = 48 * 1024 * 1024  # fits v7x (64 MiB physical) with headroom; fine on v5e/v6e


def _round_up(n, m):
    return ((n + m - 1) // m) * m


def _pad2(a, rows, cols, dtype=None):
    a = jnp.pad(a, ((0, rows - a.shape[0]), (0, cols - a.shape[1])))
    return a if dtype is None else a.astype(dtype)


def fully_block_w_output(x, params, *, tile_b=256):
    """Fused block. Returns (fwd, 1, out) mirroring the PyTorch forward()."""
    (w1, b1, gamma, beta, w2, b2, w3, b3) = params
    B, K = x.shape
    C = w1.shape[1]
    N = w3.shape[1]

    # Lane-dense padding (features -> multiples of 128).
    Kp = _round_up(K, 128)
    Cp = _round_up(C, 128)
    Np = _round_up(N, 128)

    # Batch tiling: pick tile_b so that Bp - B stays below one tile (avoid e.g. 300 -> 512).
    tile_b = min(tile_b, _round_up(B, 8))
    n_tiles = -(-B // tile_b)
    tile_b = _round_up(-(-B // n_tiles), 8)
    Bp = tile_b * n_tiles
    need_mask = (Bp != B)

    # bf16 cast fused into padding: x is streamed twice (pass 1 + pass 2), weights are MXU-native.
    x_p = _pad2(x, Bp, Kp, jnp.bfloat16)
    w1_p = _pad2(w1, Kp, Cp, jnp.bfloat16)
    b1_p = _pad2(b1, 1, Cp)
    gamma_p = _pad2(gamma, 1, Cp)
    beta_p = _pad2(beta, 1, Cp)
    # Fold the output head (valid because Dropout is identity in eval):
    #   out = (fwd @ w2 + b2) @ w3 + b3 = fwd @ (w2 @ w3) + (b2 @ w3 + b3)
    w23_p = _pad2(jnp.dot(w2, w3), Cp, Np, jnp.bfloat16)
    b23_p = _pad2(jnp.dot(b2, w3) + b3, 1, Np)

    # ------------- Pass 1: per-tile partial BN statistics (h never touches HBM) -------------
    def stats_kernel(x_ref, w1_ref, b1_ref, s_ref, ss_ref):
        h = jnp.dot(x_ref[...], w1_ref[...],
                    preferred_element_type=jnp.float32) + b1_ref[...]
        if need_mask:  # only emitted when padded batch rows exist
            row = pl.program_id(0) * tile_b + jax.lax.broadcasted_iota(
                jnp.int32, (tile_b, 1), 0)
            h = jnp.where(row < B, h, 0.0)
        s_ref[0] = jnp.sum(h, axis=0, keepdims=True)
        ss_ref[0] = jnp.sum(h * h, axis=0, keepdims=True)

    s_part, ss_part = pl.pallas_call(
        stats_kernel,
        grid=(n_tiles,),
        in_specs=[
            pl.BlockSpec((tile_b, Kp), lambda i: (i, 0)),
            pl.BlockSpec((Kp, Cp), lambda i: (0, 0)),    # resident weight
            pl.BlockSpec((1, Cp), lambda i: (0, 0)),     # resident bias
        ],
        out_specs=(
            pl.BlockSpec((1, 1, Cp), lambda i: (i, 0, 0)),
            pl.BlockSpec((1, 1, Cp), lambda i: (i, 0, 0)),
        ),
        out_shape=(
            jax.ShapeDtypeStruct((n_tiles, 1, Cp), jnp.float32),
            jax.ShapeDtypeStruct((n_tiles, 1, Cp), jnp.float32),
        ),
        compiler_params=pltpu.CompilerParams(
            dimension_semantics=("parallel",),           # no cross-tile accumulator -> dual-TC on v7x
            vmem_limit_bytes=_VMEM_LIMIT),
    )(x_p, w1_p, b1_p)

    # Tiny wrapper reduction + BN fold: one (1, Cp) op instead of per-tile rsqrt/mean/var work.
    inv_b = 1.0 / float(B)
    mean = jnp.sum(s_part, axis=0) * inv_b                           # (1, Cp)
    var = jnp.maximum(jnp.sum(ss_part, axis=0) * inv_b - mean * mean, 0.0)  # biased var, clamped
    scale = gamma_p * jax.lax.rsqrt(var + BN_EPS)
    shift = beta_p - mean * scale

    # ------------- Pass 2: recompute h, BN FMA + ReLU, folded head matmul -------------
    def apply_kernel(x_ref, w1_ref, b1_ref, scale_ref, shift_ref,
                     w23_ref, b23_ref, fwd_ref, out_ref):
        h = jnp.dot(x_ref[...], w1_ref[...],
                    preferred_element_type=jnp.float32) + b1_ref[...]
        fwd = jnp.maximum(h * scale_ref[...] + shift_ref[...], 0.0)
        fwd_ref[...] = fwd
        out_ref[...] = jnp.dot(fwd.astype(jnp.bfloat16), w23_ref[...],
                               preferred_element_type=jnp.float32) + b23_ref[...]

    fwd_full, out_full = pl.pallas_call(
        apply_kernel,
        grid=(n_tiles,),
        in_specs=[
            pl.BlockSpec((tile_b, Kp), lambda i: (i, 0)),
            pl.BlockSpec((Kp, Cp), lambda i: (0, 0)),    # resident weight
            pl.BlockSpec((1, Cp), lambda i: (0, 0)),
            pl.BlockSpec((1, Cp), lambda i: (0, 0)),     # BN scale (precomputed)
            pl.BlockSpec((1, Cp), lambda i: (0, 0)),     # BN shift (precomputed)
            pl.BlockSpec((Cp, Np), lambda i: (0, 0)),    # folded head weight
            pl.BlockSpec((1, Np), lambda i: (0, 0)),     # folded head bias
        ],
        out_specs=(
            pl.BlockSpec((tile_b, Cp), lambda i: (i, 0)),
            pl.BlockSpec((tile_b, Np), lambda i: (i, 0)),
        ),
        out_shape=(
            jax.ShapeDtypeStruct((Bp, Cp), jnp.float32),
            jax.ShapeDtypeStruct((Bp, Np), jnp.float32),
        ),
        compiler_params=pltpu.CompilerParams(
            dimension_semantics=("parallel",),           # batch tiles independent
            vmem_limit_bytes=_VMEM_LIMIT),
    )(x_p, w1_p, b1_p, scale, shift, w23_p, b23_p)

    return fwd_full[:B, :C], 1, out_full[:B, :N]


def init_params(key, input_size, linear_channels, num_classes, hidden=512):
    """Deterministic parameter init (PyTorch-Linear-style uniform bounds)."""
    ks = jax.random.split(key, 6)

    def linear(kw, kb, fan_in, fan_out):
        bound = 1.0 / jnp.sqrt(float(fan_in))
        w = jax.random.uniform(kw, (fan_in, fan_out), jnp.float32, -bound, bound)
        b = jax.random.uniform(kb, (1, fan_out), jnp.float32, -bound, bound)
        return w, b

    w1, b1 = linear(ks[0], ks[1], input_size, linear_channels)
    gamma = jnp.ones((1, linear_channels), jnp.float32)   # BN weight default
    beta = jnp.zeros((1, linear_channels), jnp.float32)   # BN bias default
    w2, b2 = linear(ks[2], ks[3], linear_channels, hidden)
    w3, b3 = linear(ks[4], ks[5], hidden, num_classes)
    return (w1, b1, gamma, beta, w2, b2, w3, b3)


def reference_kernel_math(x, params):
    """Pure-JAX reference matching the kernel's mixed precision and head fold."""
    (w1, b1, gamma, beta, w2, b2, w3, b3) = params
    h = jnp.dot(x.astype(jnp.bfloat16), w1.astype(jnp.bfloat16),
                preferred_element_type=jnp.float32) + b1
    mean = h.mean(axis=0, keepdims=True)
    var = jnp.maximum((h * h).mean(axis=0, keepdims=True) - mean * mean, 0.0)
    scale = gamma * jax.lax.rsqrt(var + BN_EPS)
    shift = beta - mean * scale
    fwd = jnp.maximum(h * scale + shift, 0.0)
    w23 = jnp.dot(w2, w3).astype(jnp.bfloat16)
    b23 = jnp.dot(b2, w3) + b3
    out = jnp.dot(fwd.astype(jnp.bfloat16), w23,
                  preferred_element_type=jnp.float32) + b23
    return fwd, out


def reference_f32(x, params):
    """Full-f32 reference with PyTorch module semantics (unfolded head)."""
    (w1, b1, gamma, beta, w2, b2, w3, b3) = params
    h = jnp.dot(x, w1) + b1
    mean = h.mean(axis=0, keepdims=True)
    var = ((h - mean) ** 2).mean(axis=0, keepdims=True)
    fwd = jnp.maximum((h - mean) * jax.lax.rsqrt(var + BN_EPS) * gamma + beta, 0.0)
    z = jnp.dot(fwd, w2) + b2
    out = jnp.dot(z, w3) + b3
    return fwd, out


if __name__ == "__main__":
    # Small shapes consistent with the module: Linear(input_size, C) + BN + ReLU,
    # output head Linear(C, 512) -> Dropout -> Linear(512, num_classes).
    # B=12 with tile_b=8 exercises multi-tile partial stats and padded-row masking.
    B, input_size, C, num_classes = 12, 32, 64, 10

    key = jax.random.PRNGKey(0)
    kx, kp = jax.random.split(key)
    x = jax.random.normal(kx, (B, input_size), jnp.float32)
    params = init_params(kp, input_size, C, num_classes)

    f = jax.jit(functools.partial(fully_block_w_output, tile_b=8))
    fwd, flag, out = f(x, params)
    jax.block_until_ready((fwd, out))

    assert int(flag) == 1
    assert fwd.shape == (B, C) and out.shape == (B, num_classes)

    # Tight check vs. a reference matching the kernel's mixed-precision / folded-head math.
    fwd_m, out_m = reference_kernel_math(x, params)
    assert jnp.allclose(fwd, fwd_m, atol=2e-4, rtol=2e-4), float(jnp.abs(fwd - fwd_m).max())
    assert jnp.allclose(out, out_m, atol=2e-3, rtol=2e-3), float(jnp.abs(out - out_m).max())

    # Sanity check vs. the full-f32 PyTorch-semantics reference (bf16-level tolerance).
    fwd_r, out_r = reference_f32(x, params)
    assert jnp.allclose(fwd, fwd_r, atol=1e-1, rtol=5e-2)
    assert jnp.allclose(out, out_r, atol=1e-1, rtol=5e-2)

    print("KERNEL_OK")
</pallas_src>

<mosaic_0001>
module attributes {stable_mosaic.version = 11 : i64} {
  func.func @stats_kernel(%arg0: i32, %arg1: memref<8x128xbf16, #tpu.memory_space<vmem>>, %arg2: memref<128x128xbf16, #tpu.memory_space<vmem>>, %arg3: memref<1x128xf32, #tpu.memory_space<vmem>>, %arg4: memref<1x1x128xf32, #tpu.memory_space<vmem>>, %arg5: memref<1x1x128xf32, #tpu.memory_space<vmem>>) attributes {dimension_semantics = [#tpu.dimension_semantics<parallel>], iteration_bounds = array<i64: 2>, scalar_prefetch = 0 : i64, scratch_operands = 0 : i64, tpu.core_type = #tpu.core_type<tc>, window_params = [{transform_indices = @transform_0, window_bounds = array<i64: 8, 128>}, {pipeline_mode = #tpu.pipeline_mode<synchronous>, transform_indices = @transform_1, window_bounds = array<i64: 128, 128>}, {pipeline_mode = #tpu.pipeline_mode<synchronous>, transform_indices = @transform_2, window_bounds = array<i64: 1, 128>}, {transform_indices = @transform_3, window_bounds = array<i64: 1, 1, 128>}, {transform_indices = @transform_4, window_bounds = array<i64: 1, 1, 128>}]} {
    %c0 = arith.constant 0 : index
    %c0_0 = arith.constant 0 : index
    %0 = vector.load %arg1[%c0, %c0_0] : memref<8x128xbf16, #tpu.memory_space<vmem>>, vector<8x128xbf16>
    %c0_1 = arith.constant 0 : index
    %c0_2 = arith.constant 0 : index
    %1 = vector.load %arg2[%c0_1, %c0_2] : memref<128x128xbf16, #tpu.memory_space<vmem>>, vector<128x128xbf16>
    %cst = arith.constant dense<0.000000e+00> : vector<8x128xf32>
    %2 = tpu.matmul %0, %1, %cst {dimension_numbers = #tpu.dot_dimension_numbers<[1], [0], [0], [1], [0, 0, 1, 1], [], []>} : vector<8x128xbf16>, vector<128x128xbf16>, vector<8x128xf32> -> vector<8x128xf32>
    %c0_3 = arith.constant 0 : index
    %c0_4 = arith.constant 0 : index
    %3 = vector.load %arg3[%c0_3, %c0_4] : memref<1x128xf32, #tpu.memory_space<vmem>>, vector<1x128xf32>
    %4 = vector.broadcast %3 : vector<1x128xf32> to vector<8x128xf32>
    %5 = arith.addf %2, %4 : vector<8x128xf32>
    %c8_i32 = arith.constant 8 : i32
    %6 = arith.muli %arg0, %c8_i32 : i32
    %7 = tpu.iota {dimensions = array<i32: 0>} : vector<8x1xi32>
    %8 = vector.broadcast %6 : i32 to vector<8x1xi32>
    %9 = arith.addi %8, %7 : vector<8x1xi32>
    %c12_i32 = arith.constant 12 : i32
    %10 = vector.broadcast %c12_i32 : i32 to vector<8x1xi32>
    %11 = arith.cmpi slt, %9, %10 : vector<8x1xi32>
    %cst_5 = arith.constant 0.000000e+00 : f32
    %12 = vector.shape_cast %11 : vector<8x1xi1> to vector<8x1xi1>
    %13 = vector.broadcast %12 : vector<8x1xi1> to vector<8x128xi1>
    %14 = vector.broadcast %cst_5 : f32 to vector<8x128xf32>
    %15 = arith.select %13, %5, %14 : vector<8x128xi1>, vector<8x128xf32>
    %cst_6 = arith.constant dense<0.000000e+00> : vector<128xf32>
    %16 = vector.multi_reduction <add>, %15, %cst_6 [0] : vector<8x128xf32> to vector<128xf32>
    %17 = vector.shape_cast %16 : vector<128xf32> to vector<1x128xf32>
    %c0_7 = arith.constant 0 : index
    %c0_8 = arith.constant 0 : index
    %c0_9 = arith.constant 0 : index
    %18 = vector.load %arg4[%c0_7, %c0_8, %c0_9] : memref<1x1x128xf32, #tpu.memory_space<vmem>>, vector<1x1x128xf32>
    %19 = vector.shape_cast %18 : vector<1x1x128xf32> to vector<1x128xf32>
    %20 = vector.shape_cast %17 : vector<1x128xf32> to vector<1x1x128xf32>
    tpu.vector_store %arg4[%c0_7, %c0_8, %c0_9], %20 {strides = array<i32>} : memref<1x1x128xf32, #tpu.memory_space<vmem>>, vector<1x1x128xf32>,
    %21 = arith.mulf %15, %15 : vector<8x128xf32>
    %cst_10 = arith.constant dense<0.000000e+00> : vector<128xf32>
    %22 = vector.multi_reduction <add>, %21, %cst_10 [0] : vector<8x128xf32> to vector<128xf32>
    %23 = vector.shape_cast %22 : vector<128xf32> to vector<1x128xf32>
    %c0_11 = arith.constant 0 : index
    %c0_12 = arith.constant 0 : index
    %c0_13 = arith.constant 0 : index
    %24 = vector.load %arg5[%c0_11, %c0_12, %c0_13] : memref<1x1x128xf32, #tpu.memory_space<vmem>>, vector<1x1x128xf32>
    %25 = vector.shape_cast %24 : vector<1x1x128xf32> to vector<1x128xf32>
    %26 = vector.shape_cast %23 : vector<1x128xf32> to vector<1x1x128xf32>
    tpu.vector_store %arg5[%c0_11, %c0_12, %c0_13], %26 {strides = array<i32>} : memref<1x1x128xf32, #tpu.memory_space<vmem>>, vector<1x1x128xf32>,
    return
  }
  func.func @transform_0(%arg0: i32) -> (i32, i32) {
    %c0_i32 = arith.constant 0 : i32
    %c0_i32_0 = arith.constant 0 : i32
    return %arg0, %c0_i32 : i32, i32
  }
  func.func @transform_1(%arg0: i32) -> (i32, i32) {
    %c0_i32 = arith.constant 0 : i32
    %c0_i32_0 = arith.constant 0 : i32
    %c0_i32_1 = arith.constant 0 : i32
    return %c0_i32, %c0_i32_0 : i32, i32
  }
  func.func @transform_2(%arg0: i32) -> (i32, i32) {
    %c0_i32 = arith.constant 0 : i32
    %c0_i32_0 = arith.constant 0 : i32
    %c0_i32_1 = arith.constant 0 : i32
    return %c0_i32, %c0_i32_0 : i32, i32
  }
  func.func @transform_3(%arg0: i32) -> (i32, i32, i32) {
    %c0_i32 = arith.constant 0 : i32
    %c0_i32_0 = arith.constant 0 : i32
    %c0_i32_1 = arith.constant 0 : i32
    return %arg0, %c0_i32, %c0_i32_0 : i32, i32, i32
  }
  func.func @transform_4(%arg0: i32) -> (i32, i32, i32) {
    %c0_i32 = arith.constant 0 : i32
    %c0_i32_0 = arith.constant 0 : i32
    %c0_i32_1 = arith.constant 0 : i32
    return %arg0, %c0_i32, %c0_i32_0 : i32, i32, i32
  }
}

module attributes {stable_mosaic.version = 11 : i64} {
  func.func @apply_kernel(%arg0: i32, %arg1: memref<8x128xbf16, #tpu.memory_space<vmem>>, %arg2: memref<128x128xbf16, #tpu.memory_space<vmem>>, %arg3: memref<1x128xf32, #tpu.memory_space<vmem>>, %arg4: memref<1x128xf32, #tpu.memory_space<vmem>>, %arg5: memref<1x128xf32, #tpu.memory_space<vmem>>, %arg6: memref<128x128xbf16, #tpu.memory_space<vmem>>, %arg7: memref<1x128xf32, #tpu.memory_space<vmem>>, %arg8: memref<8x128xf32, #tpu.memory_space<vmem>>, %arg9: memref<8x128xf32, #tpu.memory_space<vmem>>) attributes {dimension_semantics = [#tpu.dimension_semantics<parallel>], iteration_bounds = array<i64: 2>, scalar_prefetch = 0 : i64, scratch_operands = 0 : i64, tpu.core_type = #tpu.core_type<tc>, window_params = [{transform_indices = @transform_0, window_bounds = array<i64: 8, 128>}, {pipeline_mode = #tpu.pipeline_mode<synchronous>, transform_indices = @transform_1, window_bounds = array<i64: 128, 128>}, {pipeline_mode = #tpu.pipeline_mode<synchronous>, transform_indices = @transform_2, window_bounds = array<i64: 1, 128>}, {pipeline_mode = #tpu.pipeline_mode<synchronous>, transform_indices = @transform_3, window_bounds = array<i64: 1, 128>}, {pipeline_mode = #tpu.pipeline_mode<synchronous>, transform_indices = @transform_4, window_bounds = array<i64: 1, 128>}, {pipeline_mode = #tpu.pipeline_mode<synchronous>, transform_indices = @transform_5, window_bounds = array<i64: 128, 128>}, {pipeline_mode = #tpu.pipeline_mode<synchronous>, transform_indices = @transform_6, window_bounds = array<i64: 1, 128>}, {transform_indices = @transform_7, window_bounds = array<i64: 8, 128>}, {transform_indices = @transform_8, window_bounds = array<i64: 8, 128>}]} {
    %c0 = arith.constant 0 : index
    %c0_0 = arith.constant 0 : index
    %0 = vector.load %arg1[%c0, %c0_0] : memref<8x128xbf16, #tpu.memory_space<vmem>>, vector<8x128xbf16>
    %c0_1 = arith.constant 0 : index
    %c0_2 = arith.constant 0 : index
    %1 = vector.load %arg2[%c0_1, %c0_2] : memref<128x128xbf16, #tpu.memory_space<vmem>>, vector<128x128xbf16>
    %cst = arith.constant dense<0.000000e+00> : vector<8x128xf32>
    %2 = tpu.matmul %0, %1, %cst {dimension_numbers = #tpu.dot_dimension_numbers<[1], [0], [0], [1], [0, 0, 1, 1], [], []>} : vector<8x128xbf16>, vector<128x128xbf16>, vector<8x128xf32> -> vector<8x128xf32>
    %c0_3 = arith.constant 0 : index
    %c0_4 = arith.constant 0 : index
    %3 = vector.load %arg3[%c0_3, %c0_4] : memref<1x128xf32, #tpu.memory_space<vmem>>, vector<1x128xf32>
    %4 = vector.broadcast %3 : vector<1x128xf32> to vector<8x128xf32>
    %5 = arith.addf %2, %4 : vector<8x128xf32>
    %c0_5 = arith.constant 0 : index
    %c0_6 = arith.constant 0 : index
    %6 = vector.load %arg4[%c0_5, %c0_6] : memref<1x128xf32, #tpu.memory_space<vmem>>, vector<1x128xf32>
    %7 = vector.broadcast %6 : vector<1x128xf32> to vector<8x128xf32>
    %8 = arith.mulf %5, %7 : vector<8x128xf32>
    %c0_7 = arith.constant 0 : index
    %c0_8 = arith.constant 0 : index
    %9 = vector.load %arg5[%c0_7, %c0_8] : memref<1x128xf32, #tpu.memory_space<vmem>>, vector<1x128xf32>
    %10 = vector.broadcast %9 : vector<1x128xf32> to vector<8x128xf32>
    %11 = arith.addf %8, %10 : vector<8x128xf32>
    %cst_9 = arith.constant 0.000000e+00 : f32
    %12 = vector.broadcast %cst_9 : f32 to vector<8x128xf32>
    %13 = arith.maximumf %11, %12 : vector<8x128xf32>
    %c0_10 = arith.constant 0 : index
    %c0_11 = arith.constant 0 : index
    %14 = vector.load %arg8[%c0_10, %c0_11] : memref<8x128xf32, #tpu.memory_space<vmem>>, vector<8x128xf32>
    tpu.vector_store %arg8[%c0_10, %c0_11], %13 {strides = array<i32>} : memref<8x128xf32, #tpu.memory_space<vmem>>, vector<8x128xf32>,
    %15 = arith.truncf %13 : vector<8x128xf32> to vector<8x128xbf16>
    %c0_12 = arith.constant 0 : index
    %c0_13 = arith.constant 0 : index
    %16 = vector.load %arg6[%c0_12, %c0_13] : memref<128x128xbf16, #tpu.memory_space<vmem>>, vector<128x128xbf16>
    %cst_14 = arith.constant dense<0.000000e+00> : vector<8x128xf32>
    %17 = tpu.matmul %15, %16, %cst_14 {dimension_numbers = #tpu.dot_dimension_numbers<[1], [0], [0], [1], [0, 0, 1, 1], [], []>} : vector<8x128xbf16>, vector<128x128xbf16>, vector<8x128xf32> -> vector<8x128xf32>
    %c0_15 = arith.constant 0 : index
    %c0_16 = arith.constant 0 : index
    %18 = vector.load %arg7[%c0_15, %c0_16] : memref<1x128xf32, #tpu.memory_space<vmem>>, vector<1x128xf32>
    %19 = vector.broadcast %18 : vector<1x128xf32> to vector<8x128xf32>
    %20 = arith.addf %17, %19 : vector<8x128xf32>
    %c0_17 = arith.constant 0 : index
    %c0_18 = arith.constant 0 : index
    %21 = vector.load %arg9[%c0_17, %c0_18] : memref<8x128xf32, #tpu.memory_space<vmem>>, vector<8x128xf32>
    tpu.vector_store %arg9[%c0_17, %c0_18], %20 {strides = array<i32>} : memref<8x128xf32, #tpu.memory_space<vmem>>, vector<8x128xf32>,
    return
  }
  func.func @transform_0(%arg0: i32) -> (i32, i32) {
    %c0_i32 = arith.constant 0 : i32
    %c0_i32_0 = arith.constant 0 : i32
    return %arg0, %c0_i32 : i32, i32
  }
  func.func @transform_1(%arg0: i32) -> (i32, i32) {
    %c0_i32 = arith.constant 0 : i32
    %c0_i32_0 = arith.constant 0 : i32
    %c0_i32_1 = arith.constant 0 : i32
    return %c0_i32, %c0_i32_0 : i32, i32
  }
  func.func @transform_2(%arg0: i32) -> (i32, i32) {
    %c0_i32 = arith.constant 0 : i32
    %c0_i32_0 = arith.constant 0 : i32
    %c0_i32_1 = arith.constant 0 : i32
    return %c0_i32, %c0_i32_0 : i32, i32
  }
  func.func @transform_3(%arg0: i32) -> (i32, i32) {
    %c0_i32 = arith.constant 0 : i32
    %c0_i32_0 = arith.constant 0 : i32
    %c0_i32_1 = arith.constant 0 : i32
    return %c0_i32, %c0_i32_0 : i32, i32
  }
  func.func @transform_4(%arg0: i32) -> (i32, i32) {
    %c0_i32 = arith.constant 0 : i32
    %c0_i32_0 = arith.constant 0 : i32
    %c0_i32_1 = arith.constant 0 : i32
    return %c0_i32, %c0_i32_0 : i32, i32
  }
  func.func @transform_5(%arg0: i32) -> (i32, i32) {
    %c0_i32 = arith.constant 0 : i32
    %c0_i32_0 = arith.constant 0 : i32
    %c0_i32_1 = arith.constant 0 : i32
    return %c0_i32, %c0_i32_0 : i32, i32
  }
  func.func @transform_6(%arg0: i32) -> (i32, i32) {
    %c0_i32 = arith.constant 0 : i32
    %c0_i32_0 = arith.constant 0 : i32
    %c0_i32_1 = arith.constant 0 : i32
    return %c0_i32, %c0_i32_0 : i32, i32
  }
  func.func @transform_7(%arg0: i32) -> (i32, i32) {
    %c0_i32 = arith.constant 0 : i32
    %c0_i32_0 = arith.constant 0 : i32
    return %arg0, %c0_i32 : i32, i32
  }
  func.func @transform_8(%arg0: i32) -> (i32, i32) {
    %c0_i32 = arith.constant 0 : i32
    %c0_i32_0 = arith.constant 0 : i32
    return %arg0, %c0_i32 : i32, i32
  }
}

</mosaic_0001>

<bundles_post_ra>
// kernel: fully_block_w_output.3
= control target key start
LH: loop header
LB: loop body
LE: loop exit
PB: predicated region body
PF: predicated region fallthrough
CT: control target
= control target key end

     0   :  { %s1160_s0 = inlined_call_operand.vmem [shape: bf16[16,128], index: 0, kind: input, shape index: {}]   ;;  %s1161_s1 = inlined_call_operand.vmem [shape: bf16[128,128], index: 1, kind: input, shape index: {}]   ;;  %s1162_s2 = inlined_call_operand.vmem [shape: f32[1,128], index: 2, kind: input, shape index: {}]   ;;  %s1163_s3 = inlined_call_operand.vmem [shape: f32[1,128], index: 3, kind: input, shape index: {}]   ;;  %s1164_s4 = inlined_call_operand.vmem [shape: f32[1,128], index: 4, kind: input, shape index: {}]   ;;  %s1165_s5 = inlined_call_operand.vmem [shape: bf16[128,128], index: 5, kind: input, shape index: {}]   ;;  %s1166_s6 = inlined_call_operand.vmem [shape: f32[1,128], index: 6, kind: input, shape index: {}]   ;;  %s1167_s7 = inlined_call_operand.hbm [shape: f32[16,128], index: 7, kind: output, shape index: {0}]   ;;  %s1168_s8 = inlined_call_operand.hbm [shape: f32[16,128], index: 8, kind: output, shape index: {1}]  }
   0x1   :  { %1171 = sst [smem:[#allocation8_spill]] %s1160_s0 }
   0x2   :  { %14 = vsyncpa [#allocation3], 0 }
   0x3   :  { %16 = vsyncpa [#allocation3 + $0x1], 0 }
   0x4   :  { %17 = vsyncpa [#allocation5], 0 }
   0x5   :  { %19 = vsyncpa [#allocation5 + $0x1], 0  ;;  %s973_s27 = smov 0   ;;  %s975_s28 = smov 0  }
   0x6   :  { %s977_s29 = smov 0   ;;  %s979_s30 = smov 0  }
   0x7 LB: > { %s994_s9 = sadd.s32 4294967295, %s922_s30   ;;  %s679_s10 = sadd.s32 4294967294, %s922_s30   ;;  %s922_s30 = sphi %s979_s30, %s1180_s30   ;;  %s918_s29 = sphi %s977_s29, %s1179_s29   ;;  %s914_s28 = sphi %s975_s28, %s1178_s28   ;;  %s910_s27 = sphi %s973_s27, %s1177_s27  }
   0x8   : > { %s998_s11 = sadd.s32 1, %s922_s30   ;;  %s184_s12 = sadd.s32 1, %s918_s29 }
   0x9   : > { %s181_s13 = ssub.s32 %s922_s30, %s998_s11  ;;  %p194_p0 = scmp.ne.s32.totalorder %s918_s29, %s914_s28 }
   0xa   : > { %p182_p1 = scmp.eq.s32.totalorder %s181_s13, 0  ;;  %p195_p2 = scmp.eq.s32.totalorder %s994_s9, 1 }
   0xb   : > { %p200_p3 = scmp.ne.s32.totalorder %s914_s28, %s910_s27  ;;  %p201_p4 = scmp.eq.s32.totalorder %s679_s10, 1 }
   0xc   : > { %s1009_s14 = scalar_select %p182_p1, %s918_s29, %s184_s12  }
   0xd   : > { %p1011_p5 = por %p195_p2, %p194_p0  ;;  %p1015_p6 = por %p201_p4, %p200_p3 }
   0xe   : > { %p682_p7 = scmp.ge.s32.totalorder %s922_s30, 1  ;;  %p270_p8 = scmp.lt.s32.totalorder %s922_s30, 3 }
  0x10   : > { %p271_p9 = pnand %p682_p7, %p270_p8 }
  0x11   : > { %p308_p10 = scmp.lt.s32.totalorder (!%p271_p9), %s994_s9, 1  ;;  %s1174_s0 = sld [smem:[#allocation8_spill]] (!%p271_p9) }
  0x12   : > { %274 = sbr.rel (%p271_p9) target bundleno = 468 (0x1d4), region = 48  ;;  %s1081_s19 = sand.u32 (!%p271_p9), 1, %s914_s28  }
  0x13   : > { %s1170_s22 = sshll.u32 (!%p271_p9), %s1081_s19, 3  ;;  %s926_s18 = smov (!%p271_p9), [#allocation2]  }
  0x14   : > { %s300_s23 = scalar_lea.vmem (!%p271_p9), [#allocation2], %s1170_s22  ;;  %s836_s20 = sshll.u32 (!%p271_p9), %s926_s18, 4  ;;  %s837_s20 = int_to_ptr.vmem [resolvable:$false] %s836_s20 }
  0x15   : > { %s575_s25 = sshll.u32 (!%p271_p9), %s300_s23, 4  ;;  %s576_s25 = int_to_ptr.vmem [resolvable:$true] %s575_s25 }
  0x16   : > { %s832_s17 = scalar_lea.vmem (!%p271_p9), %s576_s25, 128  ;;  %p839_p0 = scmp.lt.s32.totalorder (!%p271_p9), %s576_s25, %s837_s20 }
  0x17   : > { %v816_v0 = vld [vmem:[%s1161_s1 + $0x38] sm:$0xff]   ;;  %v924_v1 = vmov 0.0   ;;  %v817_v2 = vld [vmem:[%s1161_s1 + $0x30] sm:$0xff]   ;;  %vm925_vm0 = vmmov 0   ;;  %v818_v3 = vld [vmem:[%s1161_s1 + $0x28] sm:$0xff]   ;;  %s309_s24 = scalar_select %p308_p10, %s994_s9, 1 }
  0x18   : > { %730 = vmatprep.subr.bf16.mxu0 %v924_v1  ;;  %750 = vmatprep.subr.bf16.mxu1 %v924_v1  ;;  %v824_v4 = vld [vmem:[%s1165_s5 + $0x38] sm:$0xff]   ;;  %v819_v5 = vld [vmem:[%s1161_s1 + $0x20] sm:$0xff]   ;;  %v825_v6 = vld [vmem:[%s1165_s5 + $0x30] sm:$0xff]   ;;  %p833_p11 = scmp.ne.s32.totalorder %s576_s25, %s832_s17 }
  0x19   : > { %731 = vmatpush3.bf16.msra.mxu0 %v816_v0  ;;  %746 = vmatprep.mubr.msk.bf16.mxu0 %vm925_vm0, %v924_v1  ;;  %v820_v7 = vld [vmem:[%s1161_s1 + $0x18] sm:$0xff]   ;;  %v826_v8 = vld [vmem:[%s1165_s5 + $0x28] sm:$0xff]   ;;  %v821_v9 = vld [vmem:[%s1161_s1 + $0x10] sm:$0xff]   ;;  %s685_s13 = sshll.u32 %s309_s24, 2  ;;  %s1169_s24 = sshll.u32 %s994_s9, 7 }
  0x1a   : > { %732 = vmatprep.subr.bf16.mxu0 %v924_v1  ;;  %766 = vmatprep.mubr.msk.bf16.mxu1 %vm925_vm0, %v924_v1  ;;  %v827_v10 = vld [vmem:[%s1165_s5 + $0x20] sm:$0xff]   ;;  %v822_v11 = vld [vmem:[%s1161_s1 + $0x8] sm:$0xff]   ;;  %v828_v12 = vld [vmem:[%s1165_s5 + $0x18] sm:$0xff]   ;;  %s311_s21 = scalar_lea.vmem %s1174_s0, %s685_s13  ;;  %s573_s12 = scalar_lea.hbm %s1167_s7, %s1169_s24 }
  0x1b   : > { %751 = vmatpush3.bf16.msra.mxu1 %v824_v4  ;;  %v823_v13 = vld [vmem:[%s1161_s1] sm:$0xff]   ;;  %v829_v15 = vld [vmem:[%s1165_s5 + $0x10] sm:$0xff]   ;;  %v830_v16 = vld [vmem:[%s1165_s5 + $0x8] sm:$0xff]   ;;  %s557_s13 = scalar_lea.sflag [#allocation3], %s1081_s19  ;;  %p834_p12 = pnand %p833_p11, %p1011_p5 }
  0x1c   : > { %752 = vmatprep.subr.bf16.mxu1 %v924_v1  ;;  %v313_v14 = vld [vmem:[%s311_s21] sm:$0xf]  ;;  %s838_s21 = scalar_lea.vmem %s837_s20, 256 }
  0x1d   : > { %733 = vmatpush3.bf16.msra.mxu0 %v817_v2  ;;  %v831_v17 = vld [vmem:[%s1165_s5] sm:$0xff]   ;;  %p835_p13 = pneg %p834_p12  ;;  %p840_p1 = scmp.lt.s32.totalorder %s838_s21, %s832_s17 }
  0x1e   : > { %734 = vmatprep.subr.bf16.mxu0 %v924_v1  ;;  %v686_v18 = vld [vmem:[%s1162_s2] ss:$0 sm:$0xff] }
  0x1f   : > { %753 = vmatpush3.bf16.msra.mxu1 %v825_v6  ;;  %v695_v20 = vld [vmem:[%s1163_s3] ss:$0 sm:$0xff]  ;;  %p841_p2 = por %p840_p1, %p839_p0 }
  0x20   : > { %754 = vmatprep.subr.bf16.mxu1 %v924_v1  ;;  %v696_v22 = vld [vmem:[%s1164_s4] ss:$0 sm:$0xff] }
  0x21   : > { %735 = vmatpush3.bf16.msra.mxu0 %v818_v3  ;;  %p842_p3 = pnand %p841_p2, %p835_p13 }
  0x22   : > { %736 = vmatprep.subr.bf16.mxu0 %v924_v1 }
  0x23   : > { %755 = vmatpush3.bf16.msra.mxu1 %v826_v8 }
  0x24   : > { %756 = vmatprep.subr.bf16.mxu1 %v924_v1 }
  0x25   : > { %737 = vmatpush3.bf16.msra.mxu0 %v819_v5 }
  0x26   : > { %738 = vmatprep.subr.bf16.mxu0 %v924_v1 }
  0x27   : > { %757 = vmatpush3.bf16.msra.mxu1 %v827_v10 }
  0x28   : > { %758 = vmatprep.subr.bf16.mxu1 %v924_v1 }
  0x29   : > { %739 = vmatpush3.bf16.msra.mxu0 %v820_v7 }
  0x2a   : > { %740 = vmatprep.subr.bf16.mxu0 %v924_v1 }
  0x2b   : > { %759 = vmatpush3.bf16.msra.mxu1 %v828_v12 }
  0x2c   : > { %760 = vmatprep.subr.bf16.mxu1 %v924_v1 }
  0x2d   : > { %741 = vmatpush3.bf16.msra.mxu0 %v821_v9 }
  0x2e   : > { %742 = vmatprep.subr.bf16.mxu0 %v924_v1 }
  0x2f   : > { %761 = vmatpush3.bf16.msra.mxu1 %v829_v15 }
  0x30   : > { %762 = vmatprep.subr.bf16.mxu1 %v924_v1 }
  0x31   : > { %743 = vmatpush3.bf16.msra.mxu0 %v822_v11 }
  0x32   : > { %744 = vmatprep.subr.bf16.mxu0 %v924_v1 }
  0x33   : > { %763 = vmatpush3.bf16.msra.mxu1 %v830_v16 }
  0x34   : > { %764 = vmatprep.subr.bf16.mxu1 %v924_v1 }
  0x35   : > { %745 = vmatpush3.bf16.msra.mxu0 %v823_v13 }
  0x37   : > { %765 = vmatpush3.bf16.msra.mxu1 %v831_v17 }
  0x38   : > { %747 = vmatmul.mubr.bf16.vlgmr.msra.gmra.mxu0 %v313_v14 }
  0xf8   : > { %v419_v19 = vpop.f32.mrf.mxu0 }
  0xf9   : > { %v420_v21 = vadd.f32 %v686_v18, %v419_v19 }
  0xfa   : > { %v748_v23 = vpop.f32.mrf.mxu0 }
  0xfb   : > { %v432_v24 = vmul.f32 %v695_v20, %v420_v21 }
  0xfc   : > { %v422_v25 = vpop.f32.mrf.mxu0 }
  0xfd   : > { %v440_v26 = vadd.f32 %v696_v22, %v432_v24 }
  0xfe   : > { %v749_v27 = vpop.f32.mrf.mxu0 }
  0xff   : > { %v441_v28 = vmax.f32 %v440_v26, 0.0 }
 0x101   : > { %v443_v29 = vpack.c.bf16 %v441_v28, %v441_v28  ;;  %442 = vst [vmem:[%s300_s23] sm:$0xff] %v441_v28 }
 0x103   : > { %767 = vmatmul.mubr.bf16.vlgmr.msra.gmra.mxu1 %v443_v29 }
 0x104   : > { %845 = shalt.err (!%p842_p3)
}
 0x105   : > { %s846_s23 = scalar_lea.hbm %s573_s12, 128  ;;  %s850_s24 = scalar_lea.hbm %s1167_s7, 256 }
 0x106   : > { %p847_p4 = scmp.ne.s32.totalorder %s573_s12, %s846_s23  ;;  %p851_p9 = scmp.lt.s32.totalorder %s573_s12, %s1167_s7 }
 0x107   : > { %p852_p10 = scmp.lt.s32.totalorder %s850_s24, %s846_s23 }
 0x108   : > { %p848_p7 = pnand %p847_p4, %p1011_p5 }
 0x109   : > { %p853_p11 = por %p852_p10, %p851_p9 }
 0x10a   : > { %p849_p8 = pneg %p848_p7 }
 0x10c   : > { %p854_p12 = pnand %p853_p11, %p849_p8 }
 0x10e   : > { %857 = shalt.err (!%p854_p12)
}
 0x10f   : > { %770 = dma.vmem_to_hbm [thread:$0]  (%p1011_p5), %s576_s25, 128, %s573_s12, %s557_s13   ;;  %v697_v30 = vld [vmem:[%s1166_s6] ss:$0 sm:$0xff] }
 0x110   : > { %s1175_s20 = sshll.u32 %s1081_s19, 3  ;;  %s1176_s0 = sshll.u32 %s994_s9, 7 }
 0x111   : > { %s307_s21 = scalar_lea.vmem [#allocation4], %s1175_s20  ;;  %s1118_s23 = scalar_lea.hbm %s1168_s8, %s1176_s0 }
 0x112   : > { %s588_s26 = sshll.u32 %s307_s21, 4  ;;  %s562_s25 = scalar_lea.sflag [#allocation5], %s1081_s19  ;;  %s1120_s26 = int_to_ptr.vmem [resolvable:$true] %s588_s26 }
 0x113   : > { %s858_s12 = scalar_lea.vmem %s1120_s26, 128  ;;  %s927_s9 = smov [#allocation4]  }
 0x114   : > { %p859_p13 = scmp.ne.s32.totalorder %s1120_s26, %s858_s12  ;;  %s862_s13 = sshll.u32 %s927_s9, 4  ;;  %s863_s13 = int_to_ptr.vmem [resolvable:$false] %s862_s13 }
 0x115   : > { %s864_s10 = scalar_lea.vmem %s863_s13, 256  ;;  %p865_p2 = scmp.lt.s32.totalorder %s1120_s26, %s863_s13 }
 0x116   : > { %p860_p0 = pnand %p859_p13, %p1011_p5  ;;  %p866_p3 = scmp.lt.s32.totalorder %s864_s10, %s858_s12 }
 0x118   : > { %p861_p1 = pneg %p860_p0  ;;  %p867_p4 = por %p866_p3, %p865_p2 }
 0x11a   : > { %p868_p7 = pnand %p867_p4, %p861_p1 }
 0x1c3   : > { %v549_v31 = vpop.f32.mrf.mxu1 }
 0x1c4   : > { %v550_v32 = vadd.f32 %v697_v30, %v549_v31 }
 0x1c5   : > { %v768_v33 = vpop.f32.mrf.mxu1 }
 0x1c6   : > { %555 = vst [vmem:[%s307_s21] sm:$0xff] %v550_v32 }
 0x1c7   : > { %v552_v34 = vpop.f32.mrf.mxu1 }
 0x1c8   : > { %871 = shalt.err (!%p868_p7)
}
 0x1c9   : > { %s872_s17 = scalar_lea.hbm %s1118_s23, 128  ;;  %s876_s20 = scalar_lea.hbm %s1168_s8, 256 }
 0x1ca   : > { %p873_p8 = scmp.ne.s32.totalorder %s1118_s23, %s872_s17  ;;  %p877_p11 = scmp.lt.s32.totalorder %s1118_s23, %s1168_s8 }
 0x1cb   : > { %p878_p12 = scmp.lt.s32.totalorder %s876_s20, %s872_s17 }
 0x1cc   : > { %p874_p9 = pnand %p873_p8, %p1011_p5 }
 0x1cd   : > { %p879_p13 = por %p878_p12, %p877_p11 }
 0x1ce   : > { %p875_p10 = pneg %p874_p9 }
 0x1d0   : > { %p880_p0 = pnand %p879_p13, %p875_p10 }
 0x1d2   : > { %883 = shalt.err (!%p880_p0)
}
 0x1d3   : > { %771 = dma.vmem_to_hbm [thread:$0]  (%p1011_p5), %s1120_s26, 128, %s1118_s23, %s562_s25   ;;  %v769_v35 = vpop.f32.mrf.mxu1 }
 0x1d4 PF: > { %p781_p1 = scmp.ge.s32.totalorder %s922_s30, 2  ;;  %s600_s22 = sand.u32 1, %s910_s27  }
 0x1d5   : > { %s601_s24 = scalar_lea.sflag [#allocation3], %s600_s22 }
 0x1d6   : > { %p775_p2 = pnand %p781_p1, %p1015_p6 }
 0x1d8   : > { %p776_p3 = pneg %p775_p2 }
 0x1da   : > { %901 = dma.done.wait (%p776_p3), %s601_s24, 128  }
 0x1db   : > { %903 = vsyncadd (%p776_p3), %s601_s24, 4294967168  ;;  %s610_s12 = scalar_lea.sflag [#allocation5], %s600_s22 }
 0x1dc   : > { %905 = dma.done.wait (%p776_p3), %s610_s12, 128  }
 0x1dd   : > { %907 = vsyncadd (%p776_p3), %s610_s12, 4294967168  ;;  %p22_p5 = scmp.ge.s32.totalorder %s998_s11, 4   ;;  %s1177_s27 = smov %s914_s28 }
 0x1de   : > { %s1178_s28 = smov %s918_s29  ;;  %s1179_s29 = smov %s1009_s14 }
 0x1df   : > { %s1180_s30 = smov %s998_s11  ;;  %24 = sbr.rel (!%p22_p5) target bundleno = 7 (0x7), region = 100 }
 0x1e4   :  { %615 = vsyncpa [#allocation3], 1 }
 0x1e5   :  { %617 = vsyncpa [#allocation3 + $0x1], 1 }
 0x1e6   :  { %618 = vsyncpa [#allocation5], 1 }
 0x1e7   :  { %620 = vsyncpa [#allocation5 + $0x1], 1 }

// kernel: fully_block_w_output.2
= control target key start
LH: loop header
LB: loop body
LE: loop exit
PB: predicated region body
PF: predicated region fallthrough
CT: control target
= control target key end

     0   :  { %s509_s15 = smov 0   ;;  %s566_s0 = inlined_call_operand.vmem [shape: bf16[16,128], index: 0, kind: input, shape index: {}]   ;;  %s567_s1 = inlined_call_operand.vmem [shape: bf16[128,128], index: 1, kind: input, shape index: {}]   ;;  %s568_s2 = inlined_call_operand.vmem [shape: f32[1,128], index: 2, kind: input, shape index: {}]   ;;  %s569_s3 = inlined_call_operand.vmem [shape: f32[2,1,128], index: 3, kind: output, shape index: {0}]   ;;  %s570_s4 = inlined_call_operand.vmem [shape: f32[2,1,128], index: 4, kind: output, shape index: {1}]  }
   0x1 LB: > { %s515_s16 = sadd.s32 4294967295, %s480_s15   ;;  %p413_p0 = scmp.ge.s32.totalorder %s480_s15, 1  ;;  %s480_s15 = sphi %s509_s15, %s15_s15  }
   0x2   : > { %p164_p1 = scmp.lt.s32.totalorder %s480_s15, 3 }
   0x4   : > { %p165_p2 = pnand %p413_p0, %p164_p1 }
   0x5   : > { %p190_p3 = scmp.lt.s32.totalorder (!%p165_p2), %s515_s16, 1  ;;  %s424_s12 = sshll.u32 (!%p165_p2), %s515_s16, 3 }
   0x6   : > { %168 = sbr.rel (%p165_p2) target bundleno = 255 (0xff), region = 32 }
   0xb   : > { %v466_v0 = vld [vmem:[%s567_s1 + $0x38] sm:$0xff]   ;;  %v482_v1 = vmov 0.0   ;;  %v467_v2 = vld [vmem:[%s567_s1 + $0x30] sm:$0xff]   ;;  %vm483_vm0 = vmmov 0   ;;  %v468_v3 = vld [vmem:[%s567_s1 + $0x28] sm:$0xff]   ;;  %s539_s29 = scalar_select %p190_p3, %s515_s16, 1  ;;  %v314_v10 = vlaneseq  ;;  %v316_v12 = vstv %s424_s12 }
   0xc   : > { %436 = vmatprep.subr.bf16.mxu0 %v482_v1  ;;  %452 = vmatprep.mubr.msk.bf16.mxu0 %vm483_vm0, %v482_v1  ;;  %v469_v4 = vld [vmem:[%s567_s1 + $0x20] sm:$0xff]   ;;  %v470_v5 = vld [vmem:[%s567_s1 + $0x18] sm:$0xff]   ;;  %v471_v6 = vld [vmem:[%s567_s1 + $0x10] sm:$0xff]  }
   0xd   : > { %437 = vmatpush3.bf16.msra.mxu0 %v466_v0  ;;  %v472_v7 = vld [vmem:[%s567_s1 + $0x8] sm:$0xff]   ;;  %s414_s6 = sshll.u32 %s539_s29, 2  ;;  %v473_v8 = vld [vmem:[%s567_s1] sm:$0xff]   ;;  %v315_v11 = vshrl.u32 %v314_v10, 7  ;;  %s196_s18 = scalar_lea.vmem %s569_s3, %s539_s29 }
   0xe   : > { %438 = vmatprep.subr.bf16.mxu0 %v482_v1  ;;  %s193_s11 = scalar_lea.vmem %s566_s0, %s414_s6  ;;  %v415_v14 = vld [vmem:[%s568_s2] ss:$0 sm:$0xff]  ;;  %s199_s21 = scalar_lea.vmem %s570_s4, %s539_s29 }
   0xf   : > { %v201_v9 = vld [vmem:[%s193_s11] sm:$0xf]  ;;  %v317_v13 = vadd.s32 %v316_v12, %v315_v11 }
  0x11   : > { %439 = vmatpush3.bf16.msra.mxu0 %v467_v2  ;;  %vm318_vm1 = vcmp.lt.s32.totalorder %v317_v13, 12 }
  0x12   : > { %440 = vmatprep.subr.bf16.mxu0 %v482_v1 }
  0x15   : > { %441 = vmatpush3.bf16.msra.mxu0 %v468_v3 }
  0x16   : > { %442 = vmatprep.subr.bf16.mxu0 %v482_v1 }
  0x19   : > { %443 = vmatpush3.bf16.msra.mxu0 %v469_v4 }
  0x1a   : > { %444 = vmatprep.subr.bf16.mxu0 %v482_v1 }
  0x1d   : > { %445 = vmatpush3.bf16.msra.mxu0 %v470_v5 }
  0x1e   : > { %446 = vmatprep.subr.bf16.mxu0 %v482_v1 }
  0x21   : > { %447 = vmatpush3.bf16.msra.mxu0 %v471_v6 }
  0x22   : > { %448 = vmatprep.subr.bf16.mxu0 %v482_v1 }
  0x25   : > { %449 = vmatpush3.bf16.msra.mxu0 %v472_v7 }
  0x26   : > { %450 = vmatprep.subr.bf16.mxu0 %v482_v1 }
  0x29   : > { %451 = vmatpush3.bf16.msra.mxu0 %v473_v8 }
  0x2c   : > { %453 = vmatmul.mubr.bf16.vlgmr.msra.gmra.mxu0 %v201_v9 }
  0xec   : > { %v307_v15 = vpop.f32.mrf.mxu0 }
  0xed   : > { %v308_v16 = vadd.f32 %v415_v14, %v307_v15 }
  0xee   : > { %v454_v17 = vpop.f32.mrf.mxu0 }
  0xef   : > { %v321_v18 = vsel %vm318_vm1, %v308_v16, 0.0 }
  0xf0   : > { %v322_v19 = vrot.slane %v321_v18, 4  ;;  %v329_v20 = vmul.f32 %v321_v18, %v321_v18  ;;  %v310_v21 = vpop.f32.mrf.mxu0 }
  0xf2   : > { %v323_v22 = vadd.f32 %v322_v19, %v321_v18  ;;  %v330_v23 = vrot.slane %v329_v20, 4  ;;  %v455_v24 = vpop.f32.mrf.mxu0 }
  0xf4   : > { %v324_v25 = vrot.slane %v323_v22, 2  ;;  %v331_v26 = vadd.f32 %v330_v23, %v329_v20 }
  0xf6   : > { %v325_v27 = vadd.f32 %v324_v25, %v323_v22  ;;  %v332_v28 = vrot.slane %v331_v26, 2 }
  0xf8   : > { %v326_v29 = vrot.slane %v325_v27, 1  ;;  %v333_v30 = vadd.f32 %v332_v28, %v331_v26 }
  0xfa   : > { %v327_v31 = vadd.f32 %v326_v29, %v325_v27  ;;  %v334_v32 = vrot.slane %v333_v30, 1 }
  0xfc   : > { %328 = vst [vmem:[%s196_s18] sm:$0x1] %v327_v31  ;;  %v335_v33 = vadd.f32 %v334_v32, %v333_v30 }
  0xfe   : > { %336 = vst [vmem:[%s199_s21] sm:$0x1] %v335_v33 }
  0xff PF: > { %s15_s15 = sadd.s32 1, %s480_s15  }
 0x100   : > { %p12_p4 = scmp.ge.s32.totalorder %s15_s15, 4  }
 0x102   :  { %14 = sbr.rel (!%p12_p4) target bundleno = 1 (0x1), region = 74 }

</bundles_post_ra>
